<compile_context>
chip_gen: v7x
topology: tpu7x:2x2x1
jax: 0.10.0
libtpu: 0.0.40
codegen_flags: <defaults>
</compile_context>

<pallas_src>
import functools

import jax
import jax.numpy as jnp
from jax import lax
from jax.experimental import pallas as pl
from jax.experimental.pallas import tpu as pltpu

F32 = jnp.float32
BF16 = jnp.bfloat16
VMEM_SPEC = pl.BlockSpec(memory_space=pltpu.MemorySpace.VMEM)


# ----------------------------------------------------------------------------
# Kernel A: fused conv1d bank (+ ReLU + grouped BatchNorm)
# ----------------------------------------------------------------------------
def _bank_kernel(xcol_ref, w_ref, gamma_ref, beta_ref, evencol_ref, out_ref, *,
                 eps, n_main):
    # One MXU matmul computes every bank conv at once (bf16 operands, f32 acc).
    y = jnp.dot(xcol_ref[...], w_ref[...], preferred_element_type=jnp.float32)
    y = jnp.maximum(y, 0.0)                                   # ReLU before BN
    rows = y.shape[0]
    row_id = lax.broadcasted_iota(jnp.int32, (rows, 1), 0)
    main = (row_id < n_main).astype(jnp.float32)              # [rows, 1]
    # Even kernel widths contribute one extra (t == L) conv position per batch to
    # their BatchNorm statistics (PyTorch conv-length quirk); odd widths do not.
    valid = jnp.maximum(main, evencol_ref[...])               # [rows, K*C]
    cnt = jnp.sum(valid, axis=0, keepdims=True)
    mean = jnp.sum(y * valid, axis=0, keepdims=True) / cnt
    diff = (y - mean) * valid
    var = jnp.sum(diff * diff, axis=0, keepdims=True) / cnt
    ybn = (y - mean) * lax.rsqrt(var + eps) * gamma_ref[...] + beta_ref[...]
    out_ref[...] = ybn[:n_main].astype(out_ref.dtype)


# ----------------------------------------------------------------------------
# Kernel B: maxpool + proj1 + proj2 + residual + pre_highway + highways
#           + GRU input projection   (one kernel, no HBM round trips between)
# ----------------------------------------------------------------------------
def _mid_kernel(xb_ref, res_ref, p1w_ref, p1g_ref, p1b_ref,
                p2w_ref, p2g_ref, p2b_ref, *rest,
                L, eps, num_highways, has_pre):
    if has_pre:
        prew_ref, rest = rest[0], rest[1:]
    else:
        prew_ref = None
    hw1_ref, hb1_ref, hw2_ref, hb2_ref, wi_ref, bi_ref, out_ref = rest

    x = xb_ref[...]
    rows = x.shape[0]
    t = lax.broadcasted_iota(jnp.int32, (rows, 1), 0) % L
    first = t == 0
    last = t == (L - 1)

    def shift_down(h):                     # row r <- row r-1 (time t-1)
        return jnp.concatenate(
            [jnp.zeros((1, h.shape[1]), h.dtype), h[:-1]], axis=0)

    def shift_up(h):                       # row r <- row r+1 (time t+1)
        return jnp.concatenate(
            [h[1:], jnp.zeros((1, h.shape[1]), h.dtype)], axis=0)

    # MaxPool1d(kernel=2, stride=1, padding=1)[..., :L]  ==  max(x[t-1], x[t]).
    pooled = jnp.where(first, x, jnp.maximum(x, shift_down(x)))

    def conv3_bn(h, w_ref, g_ref, b_ref, relu):
        hm1 = jnp.where(first, 0.0, shift_down(h))   # x[t-1], zero conv padding
        hp1 = jnp.where(last, 0.0, shift_up(h))      # x[t+1]
        y = (jnp.dot(hm1, w_ref[0], preferred_element_type=jnp.float32)
             + jnp.dot(h, w_ref[1], preferred_element_type=jnp.float32)
             + jnp.dot(hp1, w_ref[2], preferred_element_type=jnp.float32))
        if relu:
            y = jnp.maximum(y, 0.0)
        mean = jnp.mean(y, axis=0, keepdims=True)
        var = jnp.mean((y - mean) ** 2, axis=0, keepdims=True)
        return (y - mean) * lax.rsqrt(var + eps) * g_ref[...] + b_ref[...]

    h = conv3_bn(pooled, p1w_ref, p1g_ref, p1b_ref, relu=True)
    h = conv3_bn(h, p2w_ref, p2g_ref, p2b_ref, relu=False)
    h = h + res_ref[...]                               # residual (channels-last)

    if has_pre:                                        # highway_mismatch branch
        h = jnp.dot(h, prew_ref[...], preferred_element_type=jnp.float32)

    for i in range(num_highways):
        x1 = jnp.dot(h, hw1_ref[i], preferred_element_type=jnp.float32) + hb1_ref[i]
        x2 = jnp.dot(h, hw2_ref[i], preferred_element_type=jnp.float32) + hb2_ref[i]
        g = jax.nn.sigmoid(x2)
        h = g * jnp.maximum(x1, 0.0) + (1.0 - g) * h

    # GRU input projections (both directions, gate order r|z|n) hoisted out of
    # the recurrent loop: one lane-dense [rows, 6H] matmul.
    out_ref[...] = (jnp.dot(h, wi_ref[...], preferred_element_type=jnp.float32)
                    + bi_ref[...]).astype(out_ref.dtype)


# ----------------------------------------------------------------------------
# Kernel C: bidirectional GRU recurrence (input projections precomputed)
# ----------------------------------------------------------------------------
def _gru_kernel(xp_ref, whf_ref, bhf_ref, whb_ref, bhb_ref,
                of_ref, ob_ref, hf_s, hb_s, *, H):
    L = xp_ref.shape[0]
    hf_s[...] = jnp.zeros_like(hf_s)
    hb_s[...] = jnp.zeros_like(hb_s)

    @pl.loop(0, L)
    def _(i):
        tb = L - 1 - i
        xf = xp_ref[i]                  # [B, 6H]  Wi x + b_ih at forward time
        xb = xp_ref[tb]                 # [B, 6H]  at backward time
        hf = hf_s[...]
        hb = hb_s[...]
        # One concatenated recurrent matmul per direction (gates r|z|n).
        ghf = jnp.dot(hf, whf_ref[...], preferred_element_type=jnp.float32) + bhf_ref[...]
        ghb = jnp.dot(hb, whb_ref[...], preferred_element_type=jnp.float32) + bhb_ref[...]
        # forward direction
        rf = jax.nn.sigmoid(xf[:, 0:H] + ghf[:, 0:H])
        zf = jax.nn.sigmoid(xf[:, H:2 * H] + ghf[:, H:2 * H])
        nf = jnp.tanh(xf[:, 2 * H:3 * H] + rf * ghf[:, 2 * H:3 * H])
        hf_new = (1.0 - zf) * nf + zf * hf
        # backward direction
        rb = jax.nn.sigmoid(xb[:, 3 * H:4 * H] + ghb[:, 0:H])
        zb = jax.nn.sigmoid(xb[:, 4 * H:5 * H] + ghb[:, H:2 * H])
        nb = jnp.tanh(xb[:, 5 * H:6 * H] + rb * ghb[:, 2 * H:3 * H])
        hb_new = (1.0 - zb) * nb + zb * hb
        hf_s[...] = hf_new
        hb_s[...] = hb_new
        of_ref[i] = hf_new.astype(of_ref.dtype)
        ob_ref[tb] = hb_new.astype(ob_ref.dtype)


# ----------------------------------------------------------------------------
# Wrapper-side layout glue (im2col for the shared bank window, weight packing)
# ----------------------------------------------------------------------------
def _bank_im2col(x, K, extra):
    """x: [B, Cin, L] -> shared im2col slab (window width K, offset d = c - K//2).

    Rows 0..B*L-1 hold the compact (b, t) layout; if `extra`, B trailing rows hold
    the t == L position needed only for even-kernel BatchNorm statistics.
    """
    B, c_in, L = x.shape
    lo = K // 2
    hi = K - 1 - lo
    xp = jnp.pad(x, ((0, 0), (0, 0), (lo, hi + extra)))
    n_pos = L + extra
    cols = jnp.stack([xp[:, :, c:c + n_pos] for c in range(K)], axis=-1)  # [B,Cin,n_pos,K]
    cols = jnp.transpose(cols, (0, 2, 1, 3)).reshape(B, n_pos, c_in * K)
    main = cols[:, :L].reshape(B * L, c_in * K)
    if extra:
        return jnp.concatenate([main, cols[:, L]], axis=0)
    return main


def _bank_block_weight(bank, K):
    """Zero-padded block weight [Cin*K, K*C] for the fused bank matmul."""
    blocks = []
    for (w, _, _) in bank:
        c_out, c_in, k = w.shape
        wt = jnp.zeros((c_in, K, c_out), F32)
        c0 = K // 2 - k // 2
        wt = wt.at[:, c0:c0 + k, :].set(jnp.transpose(w, (1, 2, 0)))
        blocks.append(wt.reshape(c_in * K, c_out))
    return jnp.concatenate(blocks, axis=1)


def _conv3_weight(w):
    # PyTorch [Cout, Cin, 3] -> [3, Cin, Cout]; tap j multiplies x[t + j - 1].
    return jnp.transpose(w, (2, 1, 0)).astype(F32)


def conv_bank_fused(x, bank, K, eps=1e-5):
    B, _, L = x.shape
    c = bank[0][0].shape[0]
    extra = 1 if any(w.shape[-1] % 2 == 0 for (w, _, _) in bank) else 0
    xcol = _bank_im2col(x, K, extra).astype(BF16)          # bf16 MXU operands
    w_blk = _bank_block_weight(bank, K).astype(BF16)       # (f32 accumulation)
    gamma = jnp.concatenate([g for (_, g, _) in bank]).reshape(1, K * c).astype(F32)
    beta = jnp.concatenate([b for (_, _, b) in bank]).reshape(1, K * c).astype(F32)
    evencol = jnp.concatenate(
        [jnp.full((c,), float(w.shape[-1] % 2 == 0), F32) for (w, _, _) in bank]
    ).reshape(1, K * c)
    n_main = B * L
    return pl.pallas_call(
        functools.partial(_bank_kernel, eps=eps, n_main=n_main),
        out_shape=jax.ShapeDtypeStruct((n_main, K * c), F32),
        in_specs=[VMEM_SPEC] * 5,
        out_specs=VMEM_SPEC,
    )(xcol, w_blk, gamma, beta, evencol)


# ----------------------------------------------------------------------------
# Full CBHG forward
# ----------------------------------------------------------------------------
def cbhg_forward(x, p):
    """x: [B, in_channels, L]  ->  [B, L, 2*channels]."""
    B, c_in, L = x.shape
    bank = p["bank"]
    K = len(bank)
    channels = bank[0][0].shape[0]
    H = channels

    # ---- Kernel A: fused conv bank -> [B*L, K*channels] (lane-dense) ----
    x_bank = conv_bank_fused(x, bank, K)

    # ---- Kernel B: maxpool + proj1 + proj2 + residual + pre_highway +
    #      highways + GRU input projection -> [B*L, 6*channels] ----
    p1w, p1g, p1b = p["proj1"]
    p2w, p2g, p2b = p["proj2"]
    proj1_out, proj2_out = p1w.shape[0], p2w.shape[0]
    assert proj2_out == c_in, "residual add requires proj_channels[-1] == in_channels"

    residual_cl = jnp.transpose(x, (0, 2, 1)).reshape(B * L, c_in).astype(F32)

    has_pre = p["pre_highway"] is not None
    nh = len(p["highways"])
    hw1 = jnp.stack([jnp.transpose(w1) for (w1, _, _, _) in p["highways"]], 0).astype(F32)
    hb1 = jnp.stack([b1 for (_, b1, _, _) in p["highways"]], 0).reshape(nh, 1, channels).astype(F32)
    hw2 = jnp.stack([jnp.transpose(w2) for (_, _, w2, _) in p["highways"]], 0).astype(F32)
    hb2 = jnp.stack([b2 for (_, _, _, b2) in p["highways"]], 0).reshape(nh, 1, channels).astype(F32)

    g = p["gru"]
    wi_all = jnp.concatenate(
        [jnp.transpose(g["w_ih_f"]), jnp.transpose(g["w_ih_b"])], axis=1).astype(F32)  # [C, 6H]
    bi_all = jnp.concatenate([g["b_ih_f"], g["b_ih_b"]]).reshape(1, 6 * H).astype(F32)

    inputs = [x_bank, residual_cl,
              _conv3_weight(p1w), p1g.reshape(1, proj1_out).astype(F32),
              p1b.reshape(1, proj1_out).astype(F32),
              _conv3_weight(p2w), p2g.reshape(1, proj2_out).astype(F32),
              p2b.reshape(1, proj2_out).astype(F32)]
    if has_pre:
        inputs.append(jnp.transpose(p["pre_highway"]).astype(F32))   # [proj2_out, C]
    inputs += [hw1, hb1, hw2, hb2, wi_all, bi_all]

    xproj = pl.pallas_call(
        functools.partial(_mid_kernel, L=L, eps=1e-5,
                          num_highways=nh, has_pre=has_pre),
        out_shape=jax.ShapeDtypeStruct((B * L, 6 * H), F32),
        in_specs=[VMEM_SPEC] * len(inputs),
        out_specs=VMEM_SPEC,
    )(*inputs)

    # ---- Kernel C: bidirectional GRU recurrence ----
    xp_lb = jnp.transpose(xproj.reshape(B, L, 6 * H), (1, 0, 2))     # time-major
    whf = jnp.transpose(g["w_hh_f"]).astype(F32)                     # [H, 3H]
    whb = jnp.transpose(g["w_hh_b"]).astype(F32)
    bhf = g["b_hh_f"].reshape(1, 3 * H).astype(F32)
    bhb = g["b_hh_b"].reshape(1, 3 * H).astype(F32)
    of, ob = pl.pallas_call(
        functools.partial(_gru_kernel, H=H),
        out_shape=(jax.ShapeDtypeStruct((L, B, H), F32),
                   jax.ShapeDtypeStruct((L, B, H), F32)),
        in_specs=[VMEM_SPEC] * 5,
        out_specs=(VMEM_SPEC, VMEM_SPEC),
        scratch_shapes=[pltpu.VMEM((B, H), F32), pltpu.VMEM((B, H), F32)],
    )(xp_lb, whf, bhf, whb, bhb)

    return jnp.concatenate(
        [jnp.transpose(of, (1, 0, 2)), jnp.transpose(ob, (1, 0, 2))], axis=-1)


# ----------------------------------------------------------------------------
# Deterministic parameter init (shapes follow the PyTorch __init__)
# ----------------------------------------------------------------------------
def init_params(key, K, in_channels, channels, proj_channels, num_highways):
    keys = iter(jax.random.split(key, 128))

    def nrm(shape, scale=0.1):
        return scale * jax.random.normal(next(keys), shape, dtype=F32)

    bank = []
    for k in range(1, K + 1):
        bank.append((nrm((channels, in_channels, k)),
                     1.0 + nrm((channels,), 0.05), nrm((channels,), 0.05)))
    proj1 = (nrm((proj_channels[0], K * channels, 3)),
             1.0 + nrm((proj_channels[0],), 0.05), nrm((proj_channels[0],), 0.05))
    proj2 = (nrm((proj_channels[1], proj_channels[0], 3)),
             1.0 + nrm((proj_channels[1],), 0.05), nrm((proj_channels[1],), 0.05))

    if proj_channels[-1] != channels:
        pre_highway = nrm((channels, proj_channels[-1]))   # nn.Linear weight [out, in]
    else:
        pre_highway = None

    highways = []
    for _ in range(num_highways):
        highways.append((nrm((channels, channels)),
                         jnp.zeros((channels,), F32),       # W1.bias.data.fill_(0.0)
                         nrm((channels, channels)),
                         nrm((channels,), 0.05)))

    H = channels
    gru = dict(
        w_ih_f=nrm((3 * H, channels)), w_hh_f=nrm((3 * H, H)),
        b_ih_f=nrm((3 * H,), 0.05), b_hh_f=nrm((3 * H,), 0.05),
        w_ih_b=nrm((3 * H, channels)), w_hh_b=nrm((3 * H, H)),
        b_ih_b=nrm((3 * H,), 0.05), b_hh_b=nrm((3 * H,), 0.05))

    return dict(bank=bank, proj1=proj1, proj2=proj2,
                pre_highway=pre_highway, highways=highways, gru=gru)


if __name__ == "__main__":
    # CBHG(K=4, in_channels=32, channels=64, proj_channels=[64, 32], num_highways=2)
    K = 4
    in_channels = 32
    channels = 64
    proj_channels = (64, 32)          # proj[-1] != channels -> exercises pre_highway
    num_highways = 2
    B, L = 2, 16

    key = jax.random.PRNGKey(0)
    pkey, xkey = jax.random.split(key)
    params = init_params(pkey, K, in_channels, channels, proj_channels, num_highways)
    x = jax.random.normal(xkey, (B, in_channels, L), dtype=F32)   # [Batch, D, Length]

    out = cbhg_forward(x, params)
    out = jax.block_until_ready(out)
    assert out.shape == (B, L, 2 * channels), out.shape
    assert bool(jnp.all(jnp.isfinite(out)))
    print("KERNEL_OK")
</pallas_src>

<mosaic_0001>
module attributes {stable_mosaic.version = 11 : i64} {
  func.func @_bank_kernel(%arg0: memref<34x128xbf16, #tpu.memory_space<vmem>>, %arg1: memref<128x256xbf16, #tpu.memory_space<vmem>>, %arg2: memref<1x256xf32, #tpu.memory_space<vmem>>, %arg3: memref<1x256xf32, #tpu.memory_space<vmem>>, %arg4: memref<1x256xf32, #tpu.memory_space<vmem>>, %arg5: memref<32x256xf32, #tpu.memory_space<vmem>>) attributes {dimension_semantics = [], scalar_prefetch = 0 : i64, scratch_operands = 0 : i64, tpu.core_type = #tpu.core_type<tc>} {
    %c0 = arith.constant 0 : index
    %c0_0 = arith.constant 0 : index
    %0 = vector.load %arg0[%c0, %c0_0] : memref<34x128xbf16, #tpu.memory_space<vmem>>, vector<34x128xbf16>
    %c0_1 = arith.constant 0 : index
    %c0_2 = arith.constant 0 : index
    %1 = vector.load %arg1[%c0_1, %c0_2] : memref<128x256xbf16, #tpu.memory_space<vmem>>, vector<128x256xbf16>
    %cst = arith.constant dense<0.000000e+00> : vector<34x256xf32>
    %2 = tpu.matmul %0, %1, %cst {dimension_numbers = #tpu.dot_dimension_numbers<[1], [0], [0], [1], [0, 0, 1, 1], [], []>} : vector<34x128xbf16>, vector<128x256xbf16>, vector<34x256xf32> -> vector<34x256xf32>
    %cst_3 = arith.constant 0.000000e+00 : f32
    %3 = vector.broadcast %cst_3 : f32 to vector<34x256xf32>
    %4 = arith.maximumf %2, %3 : vector<34x256xf32>
    %5 = tpu.iota {dimensions = array<i32: 0>} : vector<34x1xi32>
    %c32_i32 = arith.constant 32 : i32
    %6 = vector.broadcast %c32_i32 : i32 to vector<34x1xi32>
    %7 = arith.cmpi slt, %5, %6 : vector<34x1xi32>
    %8 = arith.extui %7 : vector<34x1xi1> to vector<34x1xi32>
    %9 = arith.sitofp %8 : vector<34x1xi32> to vector<34x1xf32>
    %c0_4 = arith.constant 0 : index
    %c0_5 = arith.constant 0 : index
    %10 = vector.load %arg4[%c0_4, %c0_5] : memref<1x256xf32, #tpu.memory_space<vmem>>, vector<1x256xf32>
    %11 = vector.broadcast %9 : vector<34x1xf32> to vector<34x256xf32>
    %12 = vector.broadcast %10 : vector<1x256xf32> to vector<34x256xf32>
    %13 = arith.maximumf %11, %12 : vector<34x256xf32>
    %cst_6 = arith.constant dense<0.000000e+00> : vector<256xf32>
    %14 = vector.multi_reduction <add>, %13, %cst_6 [0] : vector<34x256xf32> to vector<256xf32>
    %15 = vector.shape_cast %14 : vector<256xf32> to vector<1x256xf32>
    %16 = arith.mulf %4, %13 : vector<34x256xf32>
    %cst_7 = arith.constant dense<0.000000e+00> : vector<256xf32>
    %17 = vector.multi_reduction <add>, %16, %cst_7 [0] : vector<34x256xf32> to vector<256xf32>
    %18 = vector.shape_cast %17 : vector<256xf32> to vector<1x256xf32>
    %19 = arith.divf %18, %15 : vector<1x256xf32>
    %20 = vector.broadcast %19 : vector<1x256xf32> to vector<34x256xf32>
    %21 = arith.subf %4, %20 : vector<34x256xf32>
    %22 = arith.mulf %21, %13 : vector<34x256xf32>
    %23 = arith.mulf %22, %22 : vector<34x256xf32>
    %cst_8 = arith.constant dense<0.000000e+00> : vector<256xf32>
    %24 = vector.multi_reduction <add>, %23, %cst_8 [0] : vector<34x256xf32> to vector<256xf32>
    %25 = vector.shape_cast %24 : vector<256xf32> to vector<1x256xf32>
    %26 = arith.divf %25, %15 : vector<1x256xf32>
    %27 = vector.broadcast %19 : vector<1x256xf32> to vector<34x256xf32>
    %28 = arith.subf %4, %27 : vector<34x256xf32>
    %cst_9 = arith.constant 9.99999974E-6 : f32
    %29 = vector.broadcast %cst_9 : f32 to vector<1x256xf32>
    %30 = arith.addf %26, %29 : vector<1x256xf32>
    %31 = math.rsqrt %30 : vector<1x256xf32>
    %32 = vector.broadcast %31 : vector<1x256xf32> to vector<34x256xf32>
    %33 = arith.mulf %28, %32 : vector<34x256xf32>
    %c0_10 = arith.constant 0 : index
    %c0_11 = arith.constant 0 : index
    %34 = vector.load %arg2[%c0_10, %c0_11] : memref<1x256xf32, #tpu.memory_space<vmem>>, vector<1x256xf32>
    %35 = vector.broadcast %34 : vector<1x256xf32> to vector<34x256xf32>
    %36 = arith.mulf %33, %35 : vector<34x256xf32>
    %c0_12 = arith.constant 0 : index
    %c0_13 = arith.constant 0 : index
    %37 = vector.load %arg3[%c0_12, %c0_13] : memref<1x256xf32, #tpu.memory_space<vmem>>, vector<1x256xf32>
    %38 = vector.broadcast %37 : vector<1x256xf32> to vector<34x256xf32>
    %39 = arith.addf %36, %38 : vector<34x256xf32>
    %40 = vector.extract_strided_slice %39 {offsets = [0, 0], sizes = [32, 256], strides = [1, 1]} : vector<34x256xf32> to vector<32x256xf32>
    %c0_14 = arith.constant 0 : index
    %c0_15 = arith.constant 0 : index
    %41 = vector.load %arg5[%c0_14, %c0_15] : memref<32x256xf32, #tpu.memory_space<vmem>>, vector<32x256xf32>
    tpu.vector_store %arg5[%c0_14, %c0_15], %40 {strides = array<i32>} : memref<32x256xf32, #tpu.memory_space<vmem>>, vector<32x256xf32>,
    return
  }
}

</mosaic_0001>

<bundles_post_ra>
// kernel: tpu_custom_call.1
= control target key start
LH: loop header
LB: loop body
LE: loop exit
PB: predicated region body
PF: predicated region fallthrough
CT: control target
= control target key end

     0   :  { %10 = vsyncpa [#allocation3], 0  ;;  %s821_s0 = inlined_call_operand.hbm [shape: bf16[34,128], index: 0, kind: input, shape index: {}]   ;;  %s822_s1 = inlined_call_operand.hbm [shape: bf16[128,256], index: 1, kind: input, shape index: {}]   ;;  %s823_s2 = inlined_call_operand.vmem [shape: f32[1,256], index: 2, kind: input, shape index: {}]   ;;  %s824_s3 = inlined_call_operand.vmem [shape: f32[1,256], index: 3, kind: input, shape index: {}]   ;;  %s825_s4 = inlined_call_operand.vmem [shape: f32[1,256], index: 4, kind: input, shape index: {}]   ;;  %s826_s5 = inlined_call_operand.hbm [shape: f32[32,256], index: 5, kind: output, shape index: {}]  }
   0x1   :  { %11 = vsyncpa [#allocation6], 0 }
   0x2   :  { %12 = vsyncpa [#allocation4], 0  ;;  %s624_s18 = smov [#allocation2]   ;;  %s552_s22 = scalar_lea.hbm %s821_s0, 320 }
   0x3   :  { %s18_s19 = sshll.u32 %s624_s18, 4  ;;  %p553_p0 = scmp.ne.s32.totalorder %s821_s0, %s552_s22  ;;  %s19_s19 = int_to_ptr.vmem [resolvable:$true] %s18_s19 }
   0x4   :  { %p556_p1 = scmp.lt.u32.totalorder %s552_s22, %s821_s0 }
   0x6   :  { %p558_p2 = pnand %p556_p1, %p553_p0 }
   0x8   :  { %561 = shalt.err (!%p558_p2)
}
   0x9   :  { %s562_s27 = scalar_lea.vmem %s19_s19, 320  ;;  %p567_p4 = scmp.lt.s32.totalorder %s19_s19, %s19_s19 }
   0xa   :  { %p563_p3 = scmp.ne.s32.totalorder %s19_s19, %s562_s27  ;;  %p568_p5 = scmp.lt.s32.totalorder %s562_s27, %s562_s27 }
   0xc   :  { %p569_p6 = por %p568_p5, %p567_p4 }
   0xe   :  { %p570_p7 = pnand %p569_p6, %p563_p3 }
  0x10   :  { %573 = shalt.err (!%p570_p7)
}
  0x11   :  { %s625_s28 = smov 64   ;;  %s626_s29 = smov 4  }
  0x12   :  { %24 = dma.hbm_to_vmem [thread:$0]  %s821_s0, 320, %s19_s19, [#allocation3], %s625_s28, %s625_s28, %s626_s29  }
  0x13   :  { %s627_s7 = smov [#allocation5]   ;;  %s574_s11 = scalar_lea.hbm %s822_s1, 2048 }
  0x14   :  { %s30_s8 = sshll.u32 %s627_s7, 4  ;;  %p575_p8 = scmp.ne.s32.totalorder %s822_s1, %s574_s11  ;;  %s31_s8 = int_to_ptr.vmem [resolvable:$true] %s30_s8 }
  0x15   :  { %p578_p9 = scmp.lt.u32.totalorder %s574_s11, %s822_s1 }
  0x17   :  { %p580_p10 = pnand %p578_p9, %p575_p8 }
  0x19   :  { %583 = shalt.err (!%p580_p10)
}
  0x1a   :  { %s584_s16 = scalar_lea.vmem %s31_s8, 2048  ;;  %p589_p12 = scmp.lt.s32.totalorder %s31_s8, %s31_s8 }
  0x1b   :  { %p585_p11 = scmp.ne.s32.totalorder %s31_s8, %s584_s16  ;;  %p590_p13 = scmp.lt.s32.totalorder %s584_s16, %s584_s16 }
  0x1d   :  { %p591_p0 = por %p590_p13, %p589_p12 }
  0x1f   :  { %p592_p1 = pnand %p591_p0, %p585_p11 }
  0x21   :  { %595 = shalt.err (!%p592_p1)
}
  0x22   :  { %s628_s0 = smov 128   ;;  %s629_s17 = smov 8  }
  0x23   :  { %36 = dma.hbm_to_vmem [thread:$0]  %s822_s1, 2048, %s31_s8, [#allocation6], %s628_s0, %s628_s0, %s629_s17  }
  0x24   :  { %618 = dma.done.wait [#allocation3], 320  }
  0x25   :  { %619 = vsyncadd [#allocation3], 4294966976 }
  0x26   :  { %620 = dma.done.wait [#allocation6], 2048  }
  0x27   :  { %621 = vsyncadd [#allocation6], 4294965248  ;;  %v630_v0 = vmov 0   ;;  %v517_v1 = vld [vmem:[#allocation5 + $0x4] ss:$8 sps:$4 sm:$0xff]   ;;  %v542_v18 = vld [vmem:[#allocation2 + $0x8] sm:$0xff]   ;;  %v261_v20 = vlaneseq }
  0x28   :  { %199 = vmatprep.mubr.bf16.mxu0 %v630_v0  ;;  %209 = vmatprep.mubr.bf16.mxu1 %v630_v0  ;;  %v519_v2 = vld [vmem:[#allocation5] ss:$8 sps:$4 sm:$0xff]   ;;  %v520_v3 = vld [vmem:[#allocation5 + $0x14] ss:$8 sps:$4 sm:$0xff]   ;;  %v522_v4 = vld [vmem:[#allocation5 + $0x10] ss:$8 sps:$4 sm:$0xff]  }
  0x29   :  { %167 = vmatprep.subr.bf16.mxu0 %v517_v1  ;;  %491 = vmatprep.subr.bf16.mxu1 %v517_v1  ;;  %v523_v5 = vld [vmem:[#allocation5 + $0x24] ss:$8 sps:$4 sm:$0xff]   ;;  %v525_v6 = vld [vmem:[#allocation5 + $0x20] ss:$8 sps:$4 sm:$0xff]   ;;  %v526_v7 = vld [vmem:[#allocation5 + $0x34] ss:$8 sps:$4 sm:$0xff]  }
  0x2a   :  { %168 = vmatpush1.bf16.msra.mxu0 %v519_v2  ;;  %499 = vmatpush1.bf16.msra.mxu1 %v519_v2  ;;  %v528_v8 = vld [vmem:[#allocation5 + $0x30] ss:$8 sps:$4 sm:$0xff]   ;;  %v529_v9 = vld [vmem:[#allocation5 + $0x44] ss:$8 sps:$4 sm:$0xff]   ;;  %v531_v10 = vld [vmem:[#allocation5 + $0x40] ss:$8 sps:$4 sm:$0xff]  }
  0x2b   :  { %169 = vmatprep.subr.bf16.mxu0 %v520_v3  ;;  %492 = vmatprep.subr.bf16.mxu1 %v520_v3  ;;  %v532_v11 = vld [vmem:[#allocation5 + $0x54] ss:$8 sps:$4 sm:$0xff]   ;;  %v534_v12 = vld [vmem:[#allocation5 + $0x50] ss:$8 sps:$4 sm:$0xff]   ;;  %v535_v13 = vld [vmem:[#allocation5 + $0x64] ss:$8 sps:$4 sm:$0xff]  }
  0x2c   :  { %v537_v14 = vld [vmem:[#allocation5 + $0x60] ss:$8 sps:$4 sm:$0xff]   ;;  %v538_v15 = vld [vmem:[#allocation5 + $0x74] ss:$8 sps:$4 sm:$0xff]   ;;  %v540_v16 = vld [vmem:[#allocation5 + $0x70] ss:$8 sps:$4 sm:$0xff]  }
  0x2d   :  { %v541_v17 = vld [vmem:[#allocation2] sm:$0xff]   ;;  %v543_v19 = vld [vmem:[#allocation2 + $0x10] ss:$0 sps:$4 sm:$0x11]   ;;  %v262_v21 = vshrl.u32 %v261_v20, 7  ;;  %vm284_vm0 = vcmask 1041408  }
  0x2e   :  { %170 = vmatpush1.bf16.msra.mxu0 %v522_v4  ;;  %500 = vmatpush1.bf16.msra.mxu1 %v522_v4  ;;  %v259_v23 = vld [vmem:[%s825_s4] sm:$0x3] }
  0x2f   :  { %171 = vmatprep.subr.bf16.mxu0 %v523_v5  ;;  %493 = vmatprep.subr.bf16.mxu1 %v523_v5  ;;  %v688_v22 = vsub.s32 0, %v262_v21  ;;  %v693_v24 = vsub.s32 1, %v262_v21 }
  0x31   :  { %v264_v25 = vrot.slane %v259_v23, %v688_v22  ;;  %v268_v26 = vrot.slane %v259_v23, %v693_v24 }
  0x32   :  { %172 = vmatpush1.bf16.msra.mxu0 %v525_v6  ;;  %501 = vmatpush1.bf16.msra.mxu1 %v525_v6 }
  0x33   :  { %173 = vmatprep.subr.bf16.mxu0 %v526_v7  ;;  %494 = vmatprep.subr.bf16.mxu1 %v526_v7  ;;  %v697_v27 = vmax.f32 %v264_v25, 1.0  ;;  %v699_v28 = vmax.f32 %v268_v26, 1.0  ;;  %v706_v32 = vmax.f32 %v264_v25, 0.0  ;;  %v709_v34 = vmax.f32 %v268_v26, 0.0 }
  0x35   :  { %v281_v29 = vadd.f32 %v697_v27, %v697_v27  ;;  %v293_v30 = vadd.f32 %v699_v28, %v699_v28  ;;  %v285_v36 = vsel %vm284_vm0, %v706_v32, 0.0  ;;  %v296_v38 = vsel %vm284_vm0, %v709_v34, 0.0 }
  0x36   :  { %174 = vmatpush1.bf16.msra.mxu0 %v528_v8  ;;  %502 = vmatpush1.bf16.msra.mxu1 %v528_v8 }
  0x37   :  { %175 = vmatprep.subr.bf16.mxu0 %v529_v9  ;;  %495 = vmatprep.subr.bf16.mxu1 %v529_v9  ;;  %v282_v31 = vadd.f32 %v281_v29, %v697_v27  ;;  %v294_v33 = vadd.f32 %v293_v30, %v699_v28 }
  0x39   :  { %v283_v35 = vadd.f32 %v282_v31, %v697_v27  ;;  %v295_v37 = vadd.f32 %v294_v33, %v699_v28 }
  0x3a   :  { %176 = vmatpush1.bf16.msra.mxu0 %v531_v10  ;;  %503 = vmatpush1.bf16.msra.mxu1 %v531_v10 }
  0x3b   :  { %177 = vmatprep.subr.bf16.mxu0 %v532_v11  ;;  %496 = vmatprep.subr.bf16.mxu1 %v532_v11  ;;  %v286_v39 = vadd.f32 %v285_v36, %v283_v35  ;;  %v297_v40 = vadd.f32 %v296_v38, %v295_v37 }
  0x3d   :  { %v287_v41 = vrot.slane %v286_v39, 4  ;;  %v298_v42 = vrot.slane %v297_v40, 4 }
  0x3e   :  { %178 = vmatpush1.bf16.msra.mxu0 %v534_v12  ;;  %504 = vmatpush1.bf16.msra.mxu1 %v534_v12 }
  0x3f   :  { %179 = vmatprep.subr.bf16.mxu0 %v535_v13  ;;  %497 = vmatprep.subr.bf16.mxu1 %v535_v13  ;;  %v288_v43 = vadd.f32 %v287_v41, %v286_v39  ;;  %v299_v44 = vadd.f32 %v298_v42, %v297_v40 }
  0x41   :  { %v289_v45 = vrot.slane %v288_v43, 2  ;;  %v300_v48 = vrot.slane %v299_v44, 2 }
  0x42   :  { %180 = vmatpush1.bf16.msra.mxu0 %v537_v14  ;;  %505 = vmatpush1.bf16.msra.mxu1 %v537_v14 }
  0x43   :  { %181 = vmatprep.subr.bf16.mxu0 %v538_v15  ;;  %498 = vmatprep.subr.bf16.mxu1 %v538_v15  ;;  %v290_v60 = vadd.f32 %v289_v45, %v288_v43  ;;  %v301_v63 = vadd.f32 %v300_v48, %v299_v44 }
  0x45   :  { %v291_v7 = vrot.slane %v290_v60, 1  ;;  %v302_v11 = vrot.slane %v301_v63, 1 }
  0x46   :  { %182 = vmatpush1.bf16.msra.mxu0 %v540_v16  ;;  %506 = vmatpush1.bf16.msra.mxu1 %v540_v16 }
  0x47   :  { %v292_v21 = vadd.f32 %v291_v7, %v290_v60  ;;  %v303_v29 = vadd.f32 %v302_v11, %v301_v63 }
  0x49   :  { %200 = vmatmul.mubr.bf16.vlgmr.msra.gmra.mrb[0].mxu0 %v541_v17  ;;  %210 = vmatmul.mubr.bf16.vlgmr.msra.gmra.mrb[0].mxu1 %v542_v18  ;;  %544 = vrcp.f32 %v292_v21 }
  0x4a   :  { %219 = vmatprep.mubr.bf16.mxu1 %v630_v0  ;;  %546 = vrcp.f32 %v303_v29 }
  0x51   :  { %220 = vmatmul.mubr.bf16.gmra.mrb[4].mxu1 %v543_v19 }
 0x11c   :  { %v717_v46 = vpop.f32.mrb[0].mxu0  ;;  %v719_v47 = vpop.f32.mrb[0].mxu1 }
 0x11d   :  { %v228_v49 = vmax.f32 %v717_v46, 0.0  ;;  %v722_v50 = vpop.f32.mrb[1].mxu0  ;;  %v724_v51 = vpop.f32.mrb[1].mxu1  ;;  %v232_v56 = vmax.f32 %v719_v47, 0.0 }
 0x11e   :  { %v229_v52 = vmax.f32 %v722_v50, 0.0  ;;  %v205_v53 = vpop.f32.mrb[2].mxu0  ;;  %v727_v54 = vpop.f32.mrb[2].mxu1  ;;  %v233_v61 = vmax.f32 %v724_v51, 0.0 }
 0x11f   :  { %v304_v55 = vmul.f32 %v697_v27, %v228_v49  ;;  %v230_v57 = vmax.f32 %v205_v53, 0.0  ;;  %v207_v58 = vpop.f32.mrb[3].mxu0  ;;  %v733_v59 = vpop.f32.mrb[3].mxu1  ;;  %v234_v1 = vmax.f32 %v727_v54, 0.0  ;;  %v308_v5 = vmul.f32 %v697_v27, %v232_v56 }
 0x120   :  { %v231_v62 = vmax.f32 %v207_v58, 0.0  ;;  %v305_v2 = vmul.f32 %v699_v28, %v229_v52  ;;  %v235_v4 = vmax.f32 %v733_v59, 0.0  ;;  %v309_v8 = vmul.f32 %v699_v28, %v233_v61  ;;  %v545_v47 = vpop.eup %544 }
 0x121   :  { %v306_v0 = vmul.f32 %v697_v27, %v230_v57  ;;  %v310_v12 = vmul.f32 %v697_v27, %v234_v1  ;;  %v547_v51 = vpop.eup %546 }
 0x122   :  { %v307_v3 = vmul.f32 %v699_v28, %v231_v62  ;;  %v311_v17 = vmul.f32 %v699_v28, %v235_v4 }
 0x123   :  { %v314_v6 = vadd.f32 %v306_v0, %v304_v55 }
 0x124   :  { %v325_v9 = vadd.f32 %v307_v3, %v305_v2  ;;  %v221_v10 = vpop.f32.mrb[4].mxu1 }
 0x125   :  { %v315_v13 = vadd.f32 %v314_v6, %v308_v5  ;;  %v236_v14 = vmax.f32 %v221_v10, 0.0  ;;  %v223_v15 = vpop.f32.mrb[5].mxu1 }
 0x126   :  { %v326_v16 = vadd.f32 %v325_v9, %v309_v8  ;;  %v237_v18 = vmax.f32 %v223_v15, 0.0  ;;  %v225_v19 = vpop.f32.mrb[6].mxu1 }
 0x127   :  { %v316_v20 = vadd.f32 %v315_v13, %v310_v12  ;;  %v312_v23 = vmul.f32 %v706_v32, %v236_v14  ;;  %v226_v25 = vpop.f32.mrb[7].mxu1 }
 0x128   :  { %v327_v26 = vadd.f32 %v326_v16, %v311_v17  ;;  %v313_v30 = vmul.f32 %v709_v34, %v237_v18 }
 0x129   :  { %v317_v31 = vsel %vm284_vm0, %v312_v23, 0.0 }
 0x12a   :  { %v318_v33 = vadd.f32 %v317_v31, %v316_v20  ;;  %v328_v35 = vsel %vm284_vm0, %v313_v30, 0.0 }
 0x12b   :  { %v329_v36 = vadd.f32 %v328_v35, %v327_v26 }
 0x12c   :  { %v319_v37 = vrot.slane %v318_v33, 4 }
 0x12d   :  { %v330_v38 = vrot.slane %v329_v36, 4 }
 0x12e   :  { %v320_v39 = vadd.f32 %v319_v37, %v318_v33 }
 0x12f   :  { %v331_v40 = vadd.f32 %v330_v38, %v329_v36 }
 0x130   :  { %v321_v41 = vrot.slane %v320_v39, 2 }
 0x131   :  { %v332_v42 = vrot.slane %v331_v40, 2 }
 0x132   :  { %v322_v43 = vadd.f32 %v321_v41, %v320_v39 }
 0x133   :  { %v333_v44 = vadd.f32 %v332_v42, %v331_v40 }
 0x134   :  { %v323_v45 = vrot.slane %v322_v43, 1 }
 0x135   :  { %v334_v48 = vrot.slane %v333_v44, 1 }
 0x136   :  { %v324_v53 = vadd.f32 %v323_v45, %v322_v43 }
 0x137   :  { %v335_v54 = vadd.f32 %v334_v48, %v333_v44 }
 0x138   :  { %v337_v55 = vmul.f32 %v545_v47, %v324_v53  ;;  %v406_v53 = vld [vmem:[%s823_s2] sm:$0x3]  ;;  %s631_s2 = smov [#allocation7]  }
 0x139   :  { %v339_v58 = vmul.f32 %v547_v51, %v335_v54  ;;  %v426_v54 = vld [vmem:[%s824_s3] sm:$0x3]  ;;  %s459_s3 = sshll.u32 %s631_s2, 4  ;;  %s460_s3 = int_to_ptr.vmem [resolvable:$true] %s459_s3 }
 0x13a   :  { %v753_v59 = vsub.f32 %v228_v49, %v337_v55  ;;  %v755_v60 = vsub.f32 %v230_v57, %v337_v55  ;;  %v757_v63 = vsub.f32 %v232_v56, %v337_v55  ;;  %v759_v0 = vsub.f32 %v234_v1, %v337_v55  ;;  %s596_s24 = scalar_lea.vmem %s460_s3, 1024  ;;  %p601_p3 = scmp.lt.s32.totalorder %s460_s3, %s460_s3 }
 0x13b   :  { %v348_v2 = vsub.f32 %v236_v14, %v337_v55  ;;  %v763_v3 = vsub.f32 %v229_v52, %v339_v58  ;;  %v765_v5 = vsub.f32 %v231_v62, %v339_v58  ;;  %v767_v6 = vsub.f32 %v233_v61, %v339_v58  ;;  %p597_p2 = scmp.ne.s32.totalorder %s460_s3, %s596_s24  ;;  %p602_p4 = scmp.lt.s32.totalorder %s596_s24, %s596_s24 }
 0x13c   :  { %v350_v46 = vmul.f32 %v753_v59, %v697_v27  ;;  %v352_v49 = vmul.f32 %v755_v60, %v697_v27  ;;  %v354_v56 = vmul.f32 %v757_v63, %v697_v27  ;;  %v776_v1 = vsub.f32 %v235_v4, %v339_v58 }
 0x13d   :  { %v358_v57 = vmul.f32 %v348_v2, %v706_v32  ;;  %v349_v50 = vsub.f32 %v237_v18, %v339_v58  ;;  %v351_v52 = vmul.f32 %v763_v3, %v699_v28  ;;  %v356_v61 = vmul.f32 %v759_v0, %v697_v27  ;;  %p603_p5 = por %p602_p4, %p601_p3 }
 0x13e   :  { %v360_v62 = vmul.f32 %v350_v46, %v350_v46  ;;  %v362_v7 = vmul.f32 %v352_v49, %v352_v49  ;;  %v353_v8 = vmul.f32 %v765_v5, %v699_v28  ;;  %v355_v9 = vmul.f32 %v767_v6, %v699_v28 }
 0x13f   :  { %v364_v10 = vmul.f32 %v354_v56, %v354_v56  ;;  %v359_v32 = vmul.f32 %v349_v50, %v709_v34  ;;  %v361_v4 = vmul.f32 %v351_v52, %v351_v52  ;;  %v368_v12 = vmul.f32 %v358_v57, %v358_v57  ;;  %p604_p6 = pnand %p603_p5, %p597_p2 }
 0x140   :  { %v370_v11 = vadd.f32 %v362_v7, %v360_v62  ;;  %v357_v13 = vmul.f32 %v776_v1, %v699_v28  ;;  %v363_v14 = vmul.f32 %v353_v8, %v353_v8  ;;  %v366_v15 = vmul.f32 %v356_v61, %v356_v61 }
 0x141   :  { %v365_v16 = vmul.f32 %v355_v9, %v355_v9  ;;  %v369_v19 = vmul.f32 %v359_v32, %v359_v32  ;;  %v373_v20 = vsel %vm284_vm0, %v368_v12, 0.0  ;;  %v411_v55 = vrot.slane %v406_v53, %v688_v22 }
 0x142   :  { %v371_v27 = vadd.f32 %v370_v11, %v364_v10  ;;  %v381_v17 = vadd.f32 %v363_v14, %v361_v4  ;;  %v367_v21 = vmul.f32 %v357_v13, %v357_v13  ;;  %v431_v2 = vrot.slane %v426_v54, %v688_v22 }
 0x143   :  { %v384_v34 = vsel %vm284_vm0, %v369_v19, 0.0  ;;  %v415_v56 = vrot.slane %v406_v53, %v693_v24  ;;  %v435_v57 = vrot.slane %v426_v54, %v693_v24 }
 0x144   :  { %v372_v18 = vadd.f32 %v371_v27, %v366_v15  ;;  %v382_v23 = vadd.f32 %v381_v17, %v365_v16 }
 0x146   :  { %v374_v25 = vadd.f32 %v373_v20, %v372_v18  ;;  %v383_v26 = vadd.f32 %v382_v23, %v367_v21 }
 0x148   :  { %v375_v29 = vrot.slane %v374_v25, 4  ;;  %v385_v30 = vadd.f32 %v384_v34, %v383_v26 }
 0x14a   :  { %v376_v31 = vadd.f32 %v375_v29, %v374_v25  ;;  %v386_v33 = vrot.slane %v385_v30, 4 }
 0x14c   :  { %v377_v28 = vrot.slane %v376_v31, 2  ;;  %v387_v35 = vadd.f32 %v386_v33, %v385_v30 }
 0x14e   :  { %v378_v36 = vadd.f32 %v377_v28, %v376_v31  ;;  %v388_v37 = vrot.slane %v387_v35, 2 }
 0x150   :  { %v379_v38 = vrot.slane %v378_v36, 1  ;;  %v389_v39 = vadd.f32 %v388_v37, %v387_v35 }
 0x152   :  { %v380_v40 = vadd.f32 %v379_v38, %v378_v36  ;;  %v390_v41 = vrot.slane %v389_v39, 1 }
 0x154   :  { %v392_v42 = vmul.f32 %v545_v47, %v380_v40  ;;  %v391_v43 = vadd.f32 %v390_v41, %v389_v39 }
 0x156   :  { %v394_v44 = vadd.f32 1e-05, %v392_v42  ;;  %v393_v45 = vmul.f32 %v547_v51, %v391_v43 }
 0x158   :  { %548 = vrsqrt.f32 %v394_v44  ;;  %v395_v48 = vadd.f32 1e-05, %v393_v45 }
 0x15a   :  { %550 = vrsqrt.f32 %v395_v48 }
 0x162   :  { %v549_v58 = vpop.eup %548 }
 0x163   :  { %v398_v47 = vmul.f32 %v549_v58, %v753_v59  ;;  %v400_v51 = vmul.f32 %v549_v58, %v755_v60  ;;  %v402_v46 = vmul.f32 %v549_v58, %v757_v63  ;;  %v404_v49 = vmul.f32 %v549_v58, %v759_v0 }
 0x164   :  { %v551_v50 = vpop.eup %550 }
 0x165   :  { %v418_v52 = vmul.f32 %v411_v55, %v398_v47  ;;  %v420_v61 = vmul.f32 %v411_v55, %v400_v51  ;;  %v422_v62 = vmul.f32 %v411_v55, %v402_v46  ;;  %v424_v7 = vmul.f32 %v411_v55, %v404_v49 }
 0x166   :  { %v399_v8 = vmul.f32 %v551_v50, %v763_v3  ;;  %v401_v22 = vmul.f32 %v551_v50, %v765_v5  ;;  %v403_v59 = vmul.f32 %v551_v50, %v767_v6  ;;  %v405_v60 = vmul.f32 %v551_v50, %v776_v1 }
 0x167   :  { %v438_v63 = vadd.f32 %v431_v2, %v418_v52  ;;  %v440_v9 = vadd.f32 %v431_v2, %v420_v61  ;;  %v442_v0 = vadd.f32 %v431_v2, %v422_v62  ;;  %v444_v10 = vadd.f32 %v431_v2, %v424_v7 }
 0x168   :  { %v419_v24 = vmul.f32 %v415_v56, %v399_v8  ;;  %v421_v11 = vmul.f32 %v415_v56, %v401_v22  ;;  %v423_v32 = vmul.f32 %v415_v56, %v403_v59  ;;  %v425_v4 = vmul.f32 %v415_v56, %v405_v60 }
 0x169   :  { %446 = vst [vmem:[#allocation7] sm:$0xff] %v438_v63  ;;  %448 = vst [vmem:[#allocation7 + $0x10] sm:$0xff] %v440_v9 }
 0x16a   :  { %450 = vst [vmem:[#allocation7 + $0x20] sm:$0xff] %v442_v0  ;;  %452 = vst [vmem:[#allocation7 + $0x30] sm:$0xff] %v444_v10  ;;  %v439_v3 = vadd.f32 %v435_v57, %v419_v24  ;;  %v441_v5 = vadd.f32 %v435_v57, %v421_v11  ;;  %v443_v12 = vadd.f32 %v435_v57, %v423_v32 }
 0x16b   :  { %v445_v6 = vadd.f32 %v435_v57, %v425_v4 }
 0x16c   :  { %447 = vst [vmem:[#allocation7 + $0x8] sm:$0xff] %v439_v3  ;;  %449 = vst [vmem:[#allocation7 + $0x18] sm:$0xff] %v441_v5 }
 0x16d   :  { %451 = vst [vmem:[#allocation7 + $0x28] sm:$0xff] %v443_v12  ;;  %453 = vst [vmem:[#allocation7 + $0x38] sm:$0xff] %v445_v6 }
 0x16e   :  { %607 = shalt.err (!%p604_p6)
}
 0x16f   :  { %s608_s27 = scalar_lea.hbm %s826_s5, 1024 }
 0x170   :  { %p609_p7 = scmp.ne.s32.totalorder %s826_s5, %s608_s27  ;;  %p612_p8 = scmp.lt.u32.totalorder %s608_s27, %s826_s5 }
 0x172   :  { %p614_p9 = pnand %p612_p8, %p609_p7 }
 0x174   :  { %617 = shalt.err (!%p614_p9)
}
 0x175   :  { %s632_s7 = smov 256   ;;  %s633_s8 = smov 16  }
 0x176   :  { %465 = dma.vmem_to_hbm [thread:$0]  %s460_s3, 1024, %s826_s5, [#allocation4], %s632_s7, %s632_s7, %s633_s8  }
 0x177   :  { %622 = dma.done.wait [#allocation4], 1024  }
 0x178   :  { %623 = vsyncadd [#allocation4], 4294966272 }
 0x179   :  { %469 = vsyncpa [#allocation3], 1 }
 0x17a   :  { %470 = vsyncpa [#allocation6], 1 }
 0x17b   :  { %471 = vsyncpa [#allocation4], 1 }

</bundles_post_ra>
